<compile_context>
chip_gen: v6e
topology: v6e:2x2x1
jax: 0.10.0
libtpu: 0.0.40
codegen_flags: <defaults>
</compile_context>

<pallas_src>
import functools
import math

import jax
import jax.numpy as jnp
from jax import lax
from jax.experimental import pallas as pl
from jax.experimental.pallas import tpu as pltpu

_INV_SQRT2 = 1.0 / math.sqrt(2.0)
_INV_SQRT_2PI = 1.0 / math.sqrt(2.0 * math.pi)
_TINY_F32 = float(jnp.finfo(jnp.float32).tiny)

# ~1 MiB per input stream: safe on v5e's 16 MiB scoped-VMEM default.
# v6e can profitably go to 4-8 MiB/stream (raise vmem_limit_bytes); keep
# <= 2-3 MiB on v7x (64 MiB VMEM per TensorCore).
_TARGET_BLOCK_BYTES = 1 << 20
_MIN_GRID_STEPS = 8           # >= 2 pipelined steps per v7x TensorCore


# ----------------------------- in-kernel math -----------------------------

def _gauss_max(m0, v0, m1, v1):
    """Mean/variance of max(X0, X1) for independent Gaussians.

    Matches the PyTorch formulas up to deliberate, tolerance-level changes:
      * rsqrt on the EUP instead of sqrt + divide,
      * Phi(-beta) = 1 - Phi(beta) (halves the erf count),
      * blends factored through (m0 - m1) / (t0 - t1) to trim VPU ops,
      * s = v0 + v1 clamped at float32 tiny so the degenerate zero-variance
        case stays finite (rsqrt(0) would otherwise produce NaN),
      * variance clamped at 0 against catastrophic cancellation.
    """
    s = jnp.maximum(v0 + v1, _TINY_F32)
    r = lax.rsqrt(s)                                   # EUP
    alpha = s * r                                      # == sqrt(v0 + v1)
    d = m0 - m1
    beta = d * r
    Pb = 0.5 * (1.0 + lax.erf(beta * _INV_SQRT2))      # Phi(beta)
    ab = alpha * (jnp.exp(-0.5 * beta * beta) * _INV_SQRT_2PI)   # alpha*phi(beta)
    m = m1 + d * Pb + ab                               # m0*Pb + m1*(1-Pb) + ab
    t0 = m0 * m0 + v0
    t1 = m1 * m1 + v1
    v = t1 + (t0 - t1) * Pb + (m0 + m1) * ab - m * m
    return m, jnp.maximum(v, 0.0)


def _even_lane_selector(width, wout):
    """One-hot (width, wout) f32 matrix with sel[2k, k] = 1 (even-lane picker)."""
    rows = lax.broadcasted_iota(jnp.int32, (width, wout), 0)
    cols = lax.broadcasted_iota(jnp.int32, (width, wout), 1)
    return (rows == 2 * cols).astype(jnp.float32)


def _compact_even_lanes(x, sel):
    """x[:, ::2] via a one-hot MXU matmul: lane-dense result, no strided gather.

    HIGHEST precision makes the f32 pass-through exact to <= ~1 ulp, so the
    selection is numerically a no-op; the MXU is otherwise idle in this kernel.
    """
    return jnp.dot(x, sel, preferred_element_type=jnp.float32,
                   precision=lax.Precision.HIGHEST)


# ------------------------------ Pallas kernels ------------------------------

def _analytic_kernel(mean_ref, var_ref, om_ref, ov_ref, *, W, Wout):
    # Each block row holds one 2-row band of the input feature map:
    #   lanes [0, W)  = input row 2h ("even" row), lanes [W, 2W) = row 2h+1.
    # The four 2x2 taps for output column k live at lanes 2k, 2k+1, W+2k,
    # W+2k+1.  All taps are fetched as contiguous in-bounds windows of width
    # W-1 at offsets 0, 1, W, W+1; valid results sit at even lanes (max lane
    # index needed is W-2), so no scratch staging is required.
    f32 = jnp.float32
    Wk = W - 1
    me0 = mean_ref[:, pl.ds(0, Wk)].astype(f32)
    me1 = mean_ref[:, pl.ds(1, Wk)].astype(f32)
    ve0 = var_ref[:, pl.ds(0, Wk)].astype(f32)
    ve1 = var_ref[:, pl.ds(1, Wk)].astype(f32)
    mo0 = mean_ref[:, pl.ds(W, Wk)].astype(f32)
    mo1 = mean_ref[:, pl.ds(W + 1, Wk)].astype(f32)
    vo0 = var_ref[:, pl.ds(W, Wk)].astype(f32)
    vo1 = var_ref[:, pl.ds(W + 1, Wk)].astype(f32)

    # Stage 1: pool along width (PyTorch pairing order; valid at even lanes).
    im0, iv0 = _gauss_max(me0, ve0, me1, ve1)
    im1, iv1 = _gauss_max(mo0, vo0, mo1, vo1)

    # Compact even lanes -> Wout dense lanes BEFORE stage 2: halves the
    # stage-2 VALU/EUP work, makes the output store lane-dense, and removes
    # the XLA [:, 0::2] post-pass (an extra HBM round trip of both outputs).
    sel = _even_lane_selector(Wk, Wout)
    im0 = _compact_even_lanes(im0, sel)
    iv0 = _compact_even_lanes(iv0, sel)
    im1 = _compact_even_lanes(im1, sel)
    iv1 = _compact_even_lanes(iv1, sel)

    # Stage 2: pool along height, at Wout lanes.
    om, ov = _gauss_max(im0, iv0, im1, iv1)

    # NOTE: rows of a partial last grid block are computed on padding and may
    # be non-finite; Pallas masks them on writeback, and the compaction matmul
    # only mixes lanes within a row, so they never contaminate valid rows.
    om_ref[...] = om.astype(om_ref.dtype)
    ov_ref[...] = ov.astype(ov_ref.dtype)


def _maxpool_kernel(x_ref, o_ref, *, W, Wout):
    # Sampling / MAP mode: plain 2x2 max pooling, same de-interleave scheme.
    Wk = W - 1
    x00 = x_ref[:, pl.ds(0, Wk)]
    x01 = x_ref[:, pl.ds(1, Wk)]
    x10 = x_ref[:, pl.ds(W, Wk)]
    x11 = x_ref[:, pl.ds(W + 1, Wk)]
    m = jnp.maximum(jnp.maximum(x00, x01), jnp.maximum(x10, x11))
    sel = _even_lane_selector(Wk, Wout)
    o_ref[...] = _compact_even_lanes(m.astype(jnp.float32), sel).astype(o_ref.dtype)


# ------------------------------ glue / wrapper ------------------------------

def _round_up(x, m):
    return ((x + m - 1) // m) * m


def _pick_rows(n_rows, row_bytes):
    """Rows per block: ~_TARGET_BLOCK_BYTES per input stream, multiple of 8,
    and >= _MIN_GRID_STEPS grid steps whenever the problem allows (so both v7x
    TensorCores get >= 2 pipelined steps each)."""
    if n_rows <= 8:
        return n_rows                                    # single full-array block
    tn = max(8, _TARGET_BLOCK_BYTES // max(1, row_bytes))
    tn = min(tn, max(8, pl.cdiv(n_rows, _MIN_GRID_STEPS)))
    tn = _round_up(tn, 8)
    return min(tn, n_rows)                               # == n_rows -> full dim, ok


def _pool_analytic(mean, var):
    assert mean.shape == var.shape
    B, C, H, W = mean.shape
    assert H % 2 == 0 and W % 2 == 0, "BayesMaxPool2d(2): H and W must be even"
    Hout, Wout = H // 2, W // 2
    N = B * C * Hout
    # Free reshape: row n = [input row 2h | input row 2h+1], W on the lane axis.
    m2 = mean.reshape(N, 2 * W)
    v2 = var.reshape(N, 2 * W)
    tn = _pick_rows(N, 2 * W * mean.dtype.itemsize)
    grid = (pl.cdiv(N, tn),)
    kernel = functools.partial(_analytic_kernel, W=W, Wout=Wout)
    om, ov = pl.pallas_call(
        kernel,
        out_shape=(jax.ShapeDtypeStruct((N, Wout), mean.dtype),
                   jax.ShapeDtypeStruct((N, Wout), var.dtype)),
        grid=grid,
        in_specs=[pl.BlockSpec((tn, 2 * W), lambda i: (i, 0)),
                  pl.BlockSpec((tn, 2 * W), lambda i: (i, 0))],
        out_specs=(pl.BlockSpec((tn, Wout), lambda i: (i, 0)),
                   pl.BlockSpec((tn, Wout), lambda i: (i, 0))),
        compiler_params=pltpu.CompilerParams(
            dimension_semantics=("parallel",)),
    )(m2, v2)
    return om.reshape(B, C, Hout, Wout), ov.reshape(B, C, Hout, Wout)


def _pool_map(x):
    B, C, H, W = x.shape
    assert H % 2 == 0 and W % 2 == 0, "BayesMaxPool2d(2): H and W must be even"
    Hout, Wout = H // 2, W // 2
    N = B * C * Hout
    x2 = x.reshape(N, 2 * W)
    tn = _pick_rows(N, 2 * W * x.dtype.itemsize)
    grid = (pl.cdiv(N, tn),)
    kernel = functools.partial(_maxpool_kernel, W=W, Wout=Wout)
    out = pl.pallas_call(
        kernel,
        out_shape=jax.ShapeDtypeStruct((N, Wout), x.dtype),
        grid=grid,
        in_specs=[pl.BlockSpec((tn, 2 * W), lambda i: (i, 0))],
        out_specs=pl.BlockSpec((tn, Wout), lambda i: (i, 0)),
        compiler_params=pltpu.CompilerParams(
            dimension_semantics=("parallel",)),
    )(x2)
    return out.reshape(B, C, Hout, Wout)


class BayesMaxPool2d:
    """Bayesian max-pooling layer (kernel_size = 2). No learnable parameters."""

    def __init__(self, kernel_size=2):
        if isinstance(kernel_size, int):
            kh = kw = kernel_size
        else:
            kh, kw = kernel_size
        # TODO(synk): general kernel sizes; the analytic recursion is hard-coded 2x2.
        assert kh == 2 and kw == 2, "only kernel_size=2 is supported"
        self.kernel_height, self.kernel_width = kh, kw

    def __call__(self, inputs, mode="analytic"):
        if mode == "analytic":
            mean, var = inputs
            return _pool_analytic(mean, var)
        return _pool_map(inputs)           # "sampling" or "MAP"


# ------------------------------ pure-JAX reference ------------------------------

def _ref_gauss_max(m0, v0, m1, v1):
    # Faithful transcription of the PyTorch formulas (sqrt + divide + Phi(-beta)).
    alpha = jnp.sqrt(v0 + v1)
    beta = (m0 - m1) / alpha
    Pb = 0.5 * (1.0 + lax.erf(beta * _INV_SQRT2))
    Pnb = 0.5 * (1.0 + lax.erf(-beta * _INV_SQRT2))
    pb = jnp.exp(-0.5 * beta * beta) * _INV_SQRT_2PI
    m = m0 * Pb + m1 * Pnb + alpha * pb
    v = (m0 * m0 + v0) * Pb + (m1 * m1 + v1) * Pnb + (m0 + m1) * alpha * pb - m * m
    return m, v


def _ref_analytic(mean, var):
    B, C, H, W = mean.shape
    m = mean.reshape(B, C, H, W // 2, 2)
    v = var.reshape(B, C, H, W // 2, 2)
    im, iv = _ref_gauss_max(m[..., 0], v[..., 0], m[..., 1], v[..., 1])
    im = im.reshape(B, C, H // 2, 2, W // 2)
    iv = iv.reshape(B, C, H // 2, 2, W // 2)
    om, ov = _ref_gauss_max(im[..., 0, :], iv[..., 0, :], im[..., 1, :], iv[..., 1, :])
    return om, ov


def _ref_maxpool(x):
    B, C, H, W = x.shape
    x = x.reshape(B, C, H // 2, 2, W // 2, 2)
    return jnp.max(x, axis=(3, 5))


if __name__ == "__main__":
    key = jax.random.PRNGKey(0)
    k1, k2 = jax.random.split(key)
    B, C, H, W = 2, 4, 16, 16
    mean = jax.random.normal(k1, (B, C, H, W), dtype=jnp.float32)
    var = jax.random.uniform(k2, (B, C, H, W), dtype=jnp.float32,
                             minval=0.1, maxval=1.0)

    layer = BayesMaxPool2d(kernel_size=2)

    # analytic mode
    out_mean, out_var = layer((mean, var), mode="analytic")
    out_mean = jax.block_until_ready(out_mean)
    out_var = jax.block_until_ready(out_var)
    ref_mean, ref_var = _ref_analytic(mean, var)
    assert out_mean.shape == (B, C, H // 2, W // 2)
    assert out_var.shape == (B, C, H // 2, W // 2)
    assert jnp.allclose(out_mean, ref_mean, atol=1e-5, rtol=1e-5)
    assert jnp.allclose(out_var, ref_var, atol=1e-5, rtol=1e-5)

    # sampling / MAP mode
    out_map = jax.block_until_ready(layer(mean, mode="MAP"))
    assert jnp.allclose(out_map, _ref_maxpool(mean), atol=1e-6)

    print("KERNEL_OK")
</pallas_src>

<mosaic_0001>
module attributes {stable_mosaic.version = 11 : i64} {
  func.func @_analytic_kernel(%arg0: i32, %arg1: memref<8x32xf32, #tpu.memory_space<vmem>>, %arg2: memref<8x32xf32, #tpu.memory_space<vmem>>, %arg3: memref<8x8xf32, #tpu.memory_space<vmem>>, %arg4: memref<8x8xf32, #tpu.memory_space<vmem>>) attributes {dimension_semantics = [#tpu.dimension_semantics<parallel>], iteration_bounds = array<i64: 8>, scalar_prefetch = 0 : i64, scratch_operands = 0 : i64, tpu.core_type = #tpu.core_type<tc>, window_params = [{transform_indices = @transform_0, window_bounds = array<i64: 8, 32>}, {transform_indices = @transform_1, window_bounds = array<i64: 8, 32>}, {transform_indices = @transform_2, window_bounds = array<i64: 8, 8>}, {transform_indices = @transform_3, window_bounds = array<i64: 8, 8>}]} {
    %c0 = arith.constant 0 : index
    %c0_0 = arith.constant 0 : index
    %0 = vector.load %arg1[%c0, %c0_0] : memref<8x32xf32, #tpu.memory_space<vmem>>, vector<8x15xf32>
    %c0_1 = arith.constant 0 : index
    %c1 = arith.constant 1 : index
    %1 = vector.load %arg1[%c0_1, %c1] : memref<8x32xf32, #tpu.memory_space<vmem>>, vector<8x15xf32>
    %c0_2 = arith.constant 0 : index
    %c0_3 = arith.constant 0 : index
    %2 = vector.load %arg2[%c0_2, %c0_3] : memref<8x32xf32, #tpu.memory_space<vmem>>, vector<8x15xf32>
    %c0_4 = arith.constant 0 : index
    %c1_5 = arith.constant 1 : index
    %3 = vector.load %arg2[%c0_4, %c1_5] : memref<8x32xf32, #tpu.memory_space<vmem>>, vector<8x15xf32>
    %c0_6 = arith.constant 0 : index
    %c16 = arith.constant 16 : index
    %4 = vector.load %arg1[%c0_6, %c16] : memref<8x32xf32, #tpu.memory_space<vmem>>, vector<8x15xf32>
    %c0_7 = arith.constant 0 : index
    %c17 = arith.constant 17 : index
    %5 = vector.load %arg1[%c0_7, %c17] : memref<8x32xf32, #tpu.memory_space<vmem>>, vector<8x15xf32>
    %c0_8 = arith.constant 0 : index
    %c16_9 = arith.constant 16 : index
    %6 = vector.load %arg2[%c0_8, %c16_9] : memref<8x32xf32, #tpu.memory_space<vmem>>, vector<8x15xf32>
    %c0_10 = arith.constant 0 : index
    %c17_11 = arith.constant 17 : index
    %7 = vector.load %arg2[%c0_10, %c17_11] : memref<8x32xf32, #tpu.memory_space<vmem>>, vector<8x15xf32>
    %8 = arith.addf %2, %3 : vector<8x15xf32>
    %cst = arith.constant 1.17549435E-38 : f32
    %9 = vector.broadcast %cst : f32 to vector<8x15xf32>
    %10 = arith.maximumf %8, %9 : vector<8x15xf32>
    %11 = math.rsqrt %10 : vector<8x15xf32>
    %12 = arith.mulf %10, %11 : vector<8x15xf32>
    %13 = arith.subf %0, %1 : vector<8x15xf32>
    %14 = arith.mulf %13, %11 : vector<8x15xf32>
    %cst_12 = arith.constant 0.707106769 : f32
    %15 = vector.broadcast %cst_12 : f32 to vector<8x15xf32>
    %16 = arith.mulf %14, %15 : vector<8x15xf32>
    %17 = math.erf %16 : vector<8x15xf32>
    %cst_13 = arith.constant 1.000000e+00 : f32
    %18 = vector.broadcast %cst_13 : f32 to vector<8x15xf32>
    %19 = arith.addf %18, %17 : vector<8x15xf32>
    %cst_14 = arith.constant 5.000000e-01 : f32
    %20 = vector.broadcast %cst_14 : f32 to vector<8x15xf32>
    %21 = arith.mulf %20, %19 : vector<8x15xf32>
    %cst_15 = arith.constant -5.000000e-01 : f32
    %22 = vector.broadcast %cst_15 : f32 to vector<8x15xf32>
    %23 = arith.mulf %22, %14 : vector<8x15xf32>
    %24 = arith.mulf %23, %14 : vector<8x15xf32>
    %25 = math.exp %24 : vector<8x15xf32>
    %cst_16 = arith.constant 0.398942292 : f32
    %26 = vector.broadcast %cst_16 : f32 to vector<8x15xf32>
    %27 = arith.mulf %25, %26 : vector<8x15xf32>
    %28 = arith.mulf %12, %27 : vector<8x15xf32>
    %29 = arith.mulf %13, %21 : vector<8x15xf32>
    %30 = arith.addf %1, %29 : vector<8x15xf32>
    %31 = arith.addf %30, %28 : vector<8x15xf32>
    %32 = arith.mulf %0, %0 : vector<8x15xf32>
    %33 = arith.addf %32, %2 : vector<8x15xf32>
    %34 = arith.mulf %1, %1 : vector<8x15xf32>
    %35 = arith.addf %34, %3 : vector<8x15xf32>
    %36 = arith.subf %33, %35 : vector<8x15xf32>
    %37 = arith.mulf %36, %21 : vector<8x15xf32>
    %38 = arith.addf %35, %37 : vector<8x15xf32>
    %39 = arith.addf %0, %1 : vector<8x15xf32>
    %40 = arith.mulf %39, %28 : vector<8x15xf32>
    %41 = arith.addf %38, %40 : vector<8x15xf32>
    %42 = arith.mulf %31, %31 : vector<8x15xf32>
    %43 = arith.subf %41, %42 : vector<8x15xf32>
    %cst_17 = arith.constant 0.000000e+00 : f32
    %44 = vector.broadcast %cst_17 : f32 to vector<8x15xf32>
    %45 = arith.maximumf %43, %44 : vector<8x15xf32>
    %46 = arith.addf %6, %7 : vector<8x15xf32>
    %cst_18 = arith.constant 1.17549435E-38 : f32
    %47 = vector.broadcast %cst_18 : f32 to vector<8x15xf32>
    %48 = arith.maximumf %46, %47 : vector<8x15xf32>
    %49 = math.rsqrt %48 : vector<8x15xf32>
    %50 = arith.mulf %48, %49 : vector<8x15xf32>
    %51 = arith.subf %4, %5 : vector<8x15xf32>
    %52 = arith.mulf %51, %49 : vector<8x15xf32>
    %cst_19 = arith.constant 0.707106769 : f32
    %53 = vector.broadcast %cst_19 : f32 to vector<8x15xf32>
    %54 = arith.mulf %52, %53 : vector<8x15xf32>
    %55 = math.erf %54 : vector<8x15xf32>
    %cst_20 = arith.constant 1.000000e+00 : f32
    %56 = vector.broadcast %cst_20 : f32 to vector<8x15xf32>
    %57 = arith.addf %56, %55 : vector<8x15xf32>
    %cst_21 = arith.constant 5.000000e-01 : f32
    %58 = vector.broadcast %cst_21 : f32 to vector<8x15xf32>
    %59 = arith.mulf %58, %57 : vector<8x15xf32>
    %cst_22 = arith.constant -5.000000e-01 : f32
    %60 = vector.broadcast %cst_22 : f32 to vector<8x15xf32>
    %61 = arith.mulf %60, %52 : vector<8x15xf32>
    %62 = arith.mulf %61, %52 : vector<8x15xf32>
    %63 = math.exp %62 : vector<8x15xf32>
    %cst_23 = arith.constant 0.398942292 : f32
    %64 = vector.broadcast %cst_23 : f32 to vector<8x15xf32>
    %65 = arith.mulf %63, %64 : vector<8x15xf32>
    %66 = arith.mulf %50, %65 : vector<8x15xf32>
    %67 = arith.mulf %51, %59 : vector<8x15xf32>
    %68 = arith.addf %5, %67 : vector<8x15xf32>
    %69 = arith.addf %68, %66 : vector<8x15xf32>
    %70 = arith.mulf %4, %4 : vector<8x15xf32>
    %71 = arith.addf %70, %6 : vector<8x15xf32>
    %72 = arith.mulf %5, %5 : vector<8x15xf32>
    %73 = arith.addf %72, %7 : vector<8x15xf32>
    %74 = arith.subf %71, %73 : vector<8x15xf32>
    %75 = arith.mulf %74, %59 : vector<8x15xf32>
    %76 = arith.addf %73, %75 : vector<8x15xf32>
    %77 = arith.addf %4, %5 : vector<8x15xf32>
    %78 = arith.mulf %77, %66 : vector<8x15xf32>
    %79 = arith.addf %76, %78 : vector<8x15xf32>
    %80 = arith.mulf %69, %69 : vector<8x15xf32>
    %81 = arith.subf %79, %80 : vector<8x15xf32>
    %cst_24 = arith.constant 0.000000e+00 : f32
    %82 = vector.broadcast %cst_24 : f32 to vector<8x15xf32>
    %83 = arith.maximumf %81, %82 : vector<8x15xf32>
    %84 = tpu.iota {dimensions = array<i32: 0>} : vector<15x8xi32>
    %85 = tpu.iota {dimensions = array<i32: 1>} : vector<15x8xi32>
    %c2_i32 = arith.constant 2 : i32
    %86 = vector.broadcast %c2_i32 : i32 to vector<15x8xi32>
    %87 = arith.muli %86, %85 : vector<15x8xi32>
    %88 = arith.cmpi eq, %84, %87 : vector<15x8xi32>
    %89 = arith.extui %88 : vector<15x8xi1> to vector<15x8xi32>
    %90 = arith.sitofp %89 : vector<15x8xi32> to vector<15x8xf32>
    %cst_25 = arith.constant dense<0.000000e+00> : vector<8x8xf32>
    %91 = tpu.matmul %31, %90, %cst_25 {dimension_numbers = #tpu.dot_dimension_numbers<[1], [0], [0], [1], [0, 0, 1, 1], [], []>, precision = #tpu.contract_precision<fp32>} : vector<8x15xf32>, vector<15x8xf32>, vector<8x8xf32> -> vector<8x8xf32>
    %cst_26 = arith.constant dense<0.000000e+00> : vector<8x8xf32>
    %92 = tpu.matmul %45, %90, %cst_26 {dimension_numbers = #tpu.dot_dimension_numbers<[1], [0], [0], [1], [0, 0, 1, 1], [], []>, precision = #tpu.contract_precision<fp32>} : vector<8x15xf32>, vector<15x8xf32>, vector<8x8xf32> -> vector<8x8xf32>
    %cst_27 = arith.constant dense<0.000000e+00> : vector<8x8xf32>
    %93 = tpu.matmul %69, %90, %cst_27 {dimension_numbers = #tpu.dot_dimension_numbers<[1], [0], [0], [1], [0, 0, 1, 1], [], []>, precision = #tpu.contract_precision<fp32>} : vector<8x15xf32>, vector<15x8xf32>, vector<8x8xf32> -> vector<8x8xf32>
    %cst_28 = arith.constant dense<0.000000e+00> : vector<8x8xf32>
    %94 = tpu.matmul %83, %90, %cst_28 {dimension_numbers = #tpu.dot_dimension_numbers<[1], [0], [0], [1], [0, 0, 1, 1], [], []>, precision = #tpu.contract_precision<fp32>} : vector<8x15xf32>, vector<15x8xf32>, vector<8x8xf32> -> vector<8x8xf32>
    %95 = arith.addf %92, %94 : vector<8x8xf32>
    %cst_29 = arith.constant 1.17549435E-38 : f32
    %96 = vector.broadcast %cst_29 : f32 to vector<8x8xf32>
    %97 = arith.maximumf %95, %96 : vector<8x8xf32>
    %98 = math.rsqrt %97 : vector<8x8xf32>
    %99 = arith.mulf %97, %98 : vector<8x8xf32>
    %100 = arith.subf %91, %93 : vector<8x8xf32>
    %101 = arith.mulf %100, %98 : vector<8x8xf32>
    %cst_30 = arith.constant 0.707106769 : f32
    %102 = vector.broadcast %cst_30 : f32 to vector<8x8xf32>
    %103 = arith.mulf %101, %102 : vector<8x8xf32>
    %104 = math.erf %103 : vector<8x8xf32>
    %cst_31 = arith.constant 1.000000e+00 : f32
    %105 = vector.broadcast %cst_31 : f32 to vector<8x8xf32>
    %106 = arith.addf %105, %104 : vector<8x8xf32>
    %cst_32 = arith.constant 5.000000e-01 : f32
    %107 = vector.broadcast %cst_32 : f32 to vector<8x8xf32>
    %108 = arith.mulf %107, %106 : vector<8x8xf32>
    %cst_33 = arith.constant -5.000000e-01 : f32
    %109 = vector.broadcast %cst_33 : f32 to vector<8x8xf32>
    %110 = arith.mulf %109, %101 : vector<8x8xf32>
    %111 = arith.mulf %110, %101 : vector<8x8xf32>
    %112 = math.exp %111 : vector<8x8xf32>
    %cst_34 = arith.constant 0.398942292 : f32
    %113 = vector.broadcast %cst_34 : f32 to vector<8x8xf32>
    %114 = arith.mulf %112, %113 : vector<8x8xf32>
    %115 = arith.mulf %99, %114 : vector<8x8xf32>
    %116 = arith.mulf %100, %108 : vector<8x8xf32>
    %117 = arith.addf %93, %116 : vector<8x8xf32>
    %118 = arith.addf %117, %115 : vector<8x8xf32>
    %119 = arith.mulf %91, %91 : vector<8x8xf32>
    %120 = arith.addf %119, %92 : vector<8x8xf32>
    %121 = arith.mulf %93, %93 : vector<8x8xf32>
    %122 = arith.addf %121, %94 : vector<8x8xf32>
    %123 = arith.subf %120, %122 : vector<8x8xf32>
    %124 = arith.mulf %123, %108 : vector<8x8xf32>
    %125 = arith.addf %122, %124 : vector<8x8xf32>
    %126 = arith.addf %91, %93 : vector<8x8xf32>
    %127 = arith.mulf %126, %115 : vector<8x8xf32>
    %128 = arith.addf %125, %127 : vector<8x8xf32>
    %129 = arith.mulf %118, %118 : vector<8x8xf32>
    %130 = arith.subf %128, %129 : vector<8x8xf32>
    %cst_35 = arith.constant 0.000000e+00 : f32
    %131 = vector.broadcast %cst_35 : f32 to vector<8x8xf32>
    %132 = arith.maximumf %130, %131 : vector<8x8xf32>
    %c0_36 = arith.constant 0 : index
    %c0_37 = arith.constant 0 : index
    %133 = vector.load %arg3[%c0_36, %c0_37] : memref<8x8xf32, #tpu.memory_space<vmem>>, vector<8x8xf32>
    tpu.vector_store %arg3[%c0_36, %c0_37], %118 {strides = array<i32>} : memref<8x8xf32, #tpu.memory_space<vmem>>, vector<8x8xf32>,
    %c0_38 = arith.constant 0 : index
    %c0_39 = arith.constant 0 : index
    %134 = vector.load %arg4[%c0_38, %c0_39] : memref<8x8xf32, #tpu.memory_space<vmem>>, vector<8x8xf32>
    tpu.vector_store %arg4[%c0_38, %c0_39], %132 {strides = array<i32>} : memref<8x8xf32, #tpu.memory_space<vmem>>, vector<8x8xf32>,
    return
  }
  func.func @transform_0(%arg0: i32) -> (i32, i32) {
    %c0_i32 = arith.constant 0 : i32
    %c0_i32_0 = arith.constant 0 : i32
    return %arg0, %c0_i32 : i32, i32
  }
  func.func @transform_1(%arg0: i32) -> (i32, i32) {
    %c0_i32 = arith.constant 0 : i32
    %c0_i32_0 = arith.constant 0 : i32
    return %arg0, %c0_i32 : i32, i32
  }
  func.func @transform_2(%arg0: i32) -> (i32, i32) {
    %c0_i32 = arith.constant 0 : i32
    %c0_i32_0 = arith.constant 0 : i32
    return %arg0, %c0_i32 : i32, i32
  }
  func.func @transform_3(%arg0: i32) -> (i32, i32) {
    %c0_i32 = arith.constant 0 : i32
    %c0_i32_0 = arith.constant 0 : i32
    return %arg0, %c0_i32 : i32, i32
  }
}

</mosaic_0001>

<bundles_post_ra>
// kernel: tpu_custom_call.1
= control target key start
LH: loop header
LB: loop body
LE: loop exit
PB: predicated region body
PF: predicated region fallthrough
CT: control target
= control target key end

     0   :  { %s2593_s12 = smov 0   ;;  %s2872_s0 = inlined_call_operand.vmem [shape: f32[64,32], index: 0, kind: input, shape index: {}]   ;;  %s2873_s1 = inlined_call_operand.vmem [shape: f32[64,32], index: 1, kind: input, shape index: {}]   ;;  %s2874_s2 = inlined_call_operand.vmem [shape: f32[64,8], index: 2, kind: output, shape index: {0}]   ;;  %s2875_s3 = inlined_call_operand.vmem [shape: f32[64,8], index: 3, kind: output, shape index: {1}]  }
   0x1 LB: > { %s2256_s13 = sadd.s32 4294967295, %s2565_s12   ;;  %p2260_p0 = scmp.ge.s32.totalorder %s2565_s12, 1  ;;  %s2565_s12 = sphi %s2593_s12, %s14_s12  }
   0x2   : > { %p148_p1 = scmp.lt.s32.totalorder %s2565_s12, 9 }
   0x4   : > { %p149_p2 = pnand %p2260_p0, %p148_p1 }
   0x5   : > { %p178_p3 = scmp.lt.s32.totalorder (!%p149_p2), %s2256_s13, 7  ;;  %s2567_s21 = smov (!%p149_p2), 127  }
   0x6   : > { %152 = sbr.rel (%p149_p2) target bundleno = 729 (0x2d9), region = 28  ;;  %s2568_s22 = smov (!%p149_p2), 1  }
   0x7   : > { %s2572_s23 = smov (!%p149_p2), 111  }
   0xb   : > { %s2879_s13 = smov (!%p178_p3, %s2256_s13), 7  ;;  %v2569_v28 = vmov 0.0   ;;  %v254_v29 = vlaneseq  ;;  %vm272_vm1 = vcmask 1046528   ;;  %vm2570_vm3 = vmmov 0  }
   0xc   : > { %s2601_s14 = sshll.u32 %s2879_s13, 3  ;;  %2372 = vmatprep.subr.mxu1 %v2569_v28  ;;  %2365 = vmatprep.subr.mxu0 %v2569_v28  ;;  %v2571_v46 = vmov 1.0   ;;  %vm269_vm4 = vcmask 121856   ;;  %vm2157_vm5 = vcmask 64512  }
   0xd   : > { %s185_s17 = scalar_lea.vmem %s2873_s1, %s2601_s14  ;;  %s181_s20 = scalar_lea.vmem %s2872_s0, %s2601_s14  ;;  %v255_v30 = vshrl.u32 %v254_v29, 7  ;;  %v258_v31 = vand.u32 127, %v254_v29  ;;  %2376 = vmatprep.mubr.msk.f32.mxu1 %vm2570_vm3, %v2569_v28  ;;  %2369 = vmatprep.mubr.msk.f32.mxu0 %vm2570_vm3, %v2569_v28 }
   0xe   : > { %v195_v0 = vld [vmem:[%s185_s17] sm:$0xff]  ;;  %s189_s26 = scalar_lea.vmem %s2874_s2, %s2601_s14  ;;  %s193_s29 = scalar_lea.vmem %s2875_s3, %s2601_s14 }
   0xf   : > { %197 = vrot.lane.b32.xlu0 %v195_v0, %s2567_s21  ;;  %v2612_v1 = vld [vmem:[%s181_s20] sm:$0xff]  ;;  %v256_v32 = vadd.s32 8, %v255_v30  ;;  %v259_v33 = vmul.u32 2, %v258_v31 }
  0x10   : > { %v231_v2 = vmul.f32 %v2612_v1, %v2612_v1 }
  0x11   : > { %vm261_vm0 = vcmp.eq.s32.totalorder %v256_v32, %v259_v33  ;;  %vm2636_vm2 = vcmp.eq.s32.totalorder %v255_v30, %v259_v33 }
  0x12   : > { %v2616_v3 = vadd.f32 %v231_v2, %v195_v0  ;;  %v2628_v34 = vsel %vm261_vm0, 1.0, %v2569_v28  ;;  %v2265_v38 = vsel %vm2636_vm2, 1.0, %v2569_v28 }
  0x13   : > { %205 = vrot.lane.b32.xlu0 %v2612_v1, %s2567_s21  ;;  %v274_v35 = vsel %vm272_vm1, %v2628_v34, 0  ;;  %2366 = vmatpush3.msk.msra.mxu0 %vm272_vm1, %v2628_v34  ;;  %v2647_v40 = vsub.f32 %v2265_v38, %v2265_v38 }
  0x14   : > { %234 = vrot.lane.b32.xlu1 %v2616_v3, %s2567_s21  ;;  %v2634_v36 = vsub.f32 %v274_v35, %v274_v35  ;;  %2367 = vmatprep.subr.mxu0 %v2569_v28 }
  0x15   : > { %v2652_v42 = vand.u32 4294901760, %v2647_v40  ;;  %2368 = vmatpush3.msk.msra.mxu0 %vm2636_vm2, %v2571_v46 }
  0x16   : > { %v2645_v39 = vand.u32 4294901760, %v2634_v36  ;;  %2379 = vmatprep.subr.mxu0 %v2569_v28 }
  0x17   : > { %v392_v44 = vsub.f32 %v2647_v40, %v2652_v42 }
  0x18   : > { %v385_v41 = vsub.f32 %v2634_v36, %v2645_v39 }
  0x19   : > { %v2659_v45 = vand.u32 4294901760, %v392_v44 }
  0x1a   : > { %v2654_v43 = vand.u32 4294901760, %v385_v41 }
  0x1c   : > { %2373 = vmatpush3.msra.mxu1 %v2654_v43 }
  0x1d   : > { %2374 = vmatprep.subr.mxu1 %v2569_v28 }
  0x1e   : > { %2375 = vmatpush3.msra.mxu1 %v2659_v45 }
  0x1f   : > { %2386 = vmatprep.subr.mxu1 %v2569_v28 }
  0x81   : > { %v198_v4 = vpop.permute.xlu0 %197 }
  0x82   : > { %v200_v5 = vadd.f32 %v198_v4, %v195_v0 }
  0x84   : > { %v201_v6 = vmax.f32 %v200_v5, 1.1754944e-38 }
  0x85   : > { %v206_v7 = vpop.permute.xlu0 %205 }
  0x86   : > { %2547 = vrsqrt.f32 %v201_v6  ;;  %v208_v8 = vsub.f32 %v2612_v1, %v206_v7  ;;  %v235_v17 = vpop.permute.xlu1 %234  ;;  %v244_v25 = vadd.f32 %v206_v7, %v2612_v1 }
  0x87   : > { %v237_v23 = vsub.f32 %v2616_v3, %v235_v17 }
  0x93   : > { %v2548_v9 = vpop.eup %2547 }
  0x94   : > { %v209_v10 = vmul.f32 %v2548_v9, %v208_v8  ;;  %v203_v20 = vmul.f32 %v2548_v9, %v201_v6 }
  0x96   : > { %v210_v11 = vmul.f32 0.70710677, %v209_v10  ;;  %v214_v12 = vmul.f32 -0.5, %v209_v10 }
  0x98   : > { %2549 = verf.f32 %v210_v11  ;;  %v215_v13 = vmul.f32 %v214_v12, %v209_v10 }
  0x9a   : > { %v216_v14 = vmul.f32 1.442695, %v215_v13 }
  0x9c   : > { %2551 = vpow2.f32 %v216_v14 }
  0xa5   : > { %v2550_v15 = vpop.eup %2549 }
  0xa6   : > { %v212_v16 = vadd.f32 1.0, %v2550_v15 }
  0xa8   : > { %v213_v18 = vmul.f32 0.5, %v212_v16 }
  0xa9   : > { %v2552_v19 = vpop.eup %2551 }
  0xaa   : > { %v218_v21 = vmul.f32 0.3989423, %v2552_v19  ;;  %v220_v22 = vmul.f32 %v213_v18, %v208_v8  ;;  %v238_v26 = vmul.f32 %v237_v23, %v213_v18 }
  0xac   : > { %v219_v24 = vmul.f32 %v218_v21, %v203_v20  ;;  %222 = vrot.lane.b32.xlu1 %v220_v22, %s2568_s22 }
  0xae   : > { %227 = vrot.lane.b32.xlu0 %v219_v24, %s2568_s22  ;;  %v245_v27 = vmul.f32 %v244_v25, %v219_v24 }
  0xb0   : > { %240 = vrot.lane.b32.xlu1 %v238_v26, %s2568_s22 }
  0xb2   : > { %247 = vrot.lane.b32.xlu0 %v245_v27, %s2568_s22 }
 0x11e   : > { %v223_v47 = vpop.permute.xlu1 %222 }
 0x11f   : > { %v225_v48 = vadd.f32 %v223_v47, %v2612_v1 }
 0x120   : > { %v228_v49 = vpop.permute.xlu0 %227 }
 0x121   : > { %v230_v50 = vadd.f32 %v228_v49, %v225_v48 }
 0x122   : > { %v241_v51 = vpop.permute.xlu1 %240 }
 0x123   : > { %v243_v52 = vadd.f32 %v241_v51, %v2616_v3  ;;  %267 = vrot.lane.b32.xlu1 %v230_v50, %s2567_s21  ;;  %v251_v55 = vmul.f32 %v230_v50, %v230_v50 }
 0x124   : > { %v248_v53 = vpop.permute.xlu0 %247 }
 0x125   : > { %v250_v54 = vadd.f32 %v248_v53, %v243_v52 }
 0x127   : > { %v252_v56 = vsub.f32 %v250_v54, %v251_v55  ;;  %1199 = vrot.lane.b32.xlu1 %v230_v50, %s2572_s23 }
 0x129   : > { %v253_v57 = vmax.f32 %v252_v56, 0.0 }
 0x12b   : > { %736 = vrot.lane.b32.xlu0 %v253_v57, %s2567_s21 }
 0x12f   : > { %1662 = vrot.lane.b32.xlu0 %v253_v57, %s2572_s23 }
 0x195   : > { %v268_v58 = vpop.permute.xlu1 %267 }
 0x196   : > { %v270_v59 = vsel %vm269_vm4, %v268_v58, 0 }
 0x197   : > { %v343_v60 = vand.u32 4294901760, %v270_v59 }
 0x199   : > { %v344_v61 = vsub.f32 %v270_v59, %v343_v60  ;;  %2377 = vmatmul.mubr.f32.vlgmr.msra.gmra.mxu1 %v343_v60  ;;  %v1200_v6 = vpop.permute.xlu1 %1199 }
 0x19a   : > { %2387 = vmatpush3.msk.msra.mxu1 %vm272_vm1, %v2628_v34  ;;  %2390 = vmatprep.mubr.msk.f32.mxu1 %vm2570_vm3, %v2569_v28  ;;  %v1201_v8 = vsel %vm269_vm4, %v1200_v6, 0 }
 0x19b   : > { %v345_v62 = vand.u32 4294901760, %v344_v61  ;;  %2388 = vmatprep.subr.mxu1 %v2569_v28  ;;  %v2745_v10 = vand.u32 4294901760, %v1201_v8 }
 0x19c   : > { %2389 = vmatpush3.msk.msra.mxu1 %vm2636_vm2, %v2571_v46 }
 0x19d   : > { %v737_v63 = vpop.permute.xlu0 %736  ;;  %2391 = vmatmul.mubr.f32.vlgmr.msra.gmra.mxu1 %v345_v62  ;;  %2400 = vmatprep.subr.mxu1 %v2569_v28  ;;  %v346_v0 = vsub.f32 %v344_v61, %v345_v62  ;;  %v1271_v11 = vsub.f32 %v1201_v8, %v2745_v10 }
 0x19e   : > { %v738_v1 = vsel %vm269_vm4, %v737_v63, 0  ;;  %2401 = vmatpush3.msk.msra.mxu1 %vm272_vm1, %v2628_v34  ;;  %2404 = vmatprep.mubr.msk.f32.mxu1 %vm2570_vm3, %v2569_v28 }
 0x19f   : > { %2402 = vmatprep.subr.mxu1 %v2569_v28  ;;  %v347_v2 = vand.u32 4294901760, %v346_v0  ;;  %v2695_v3 = vand.u32 4294901760, %v738_v1  ;;  %v1272_v12 = vand.u32 4294901760, %v1271_v11 }
 0x1a0   : > { %2403 = vmatpush3.msk.msra.mxu1 %vm2636_vm2, %v2571_v46 }
 0x1a1   : > { %2370 = vmatmul.mubr.f32.vlgmr.msra.gmra.mxu0 %v347_v2  ;;  %2405 = vmatmul.mubr.f32.vlgmr.msra.gmra.mxu1 %v343_v60  ;;  %v808_v4 = vsub.f32 %v738_v1, %v2695_v3  ;;  %v1273_v13 = vsub.f32 %v1271_v11, %v1272_v12  ;;  %v1663_v14 = vpop.permute.xlu0 %1662 }
 0x1a2   : > { %2380 = vmatpush3.msra.mxu0 %v2634_v36  ;;  %2414 = vmatprep.subr.mxu1 %v2569_v28  ;;  %v1664_v15 = vsel %vm269_vm4, %v1663_v14, 0 }
 0x1a3   : > { %2381 = vmatprep.subr.mxu0 %v2569_v28  ;;  %2415 = vmatpush3.msra.mxu1 %v2654_v43  ;;  %v809_v5 = vand.u32 4294901760, %v808_v4  ;;  %v1274_v16 = vand.u32 4294901760, %v1273_v13  ;;  %v1733_v17 = vand.u32 4294901760, %v1664_v15 }
 0x1a4   : > { %2382 = vmatpush3.msra.mxu0 %v2647_v40  ;;  %2416 = vmatprep.subr.mxu1 %v2569_v28 }
 0x1a5   : > { %2383 = vmatprep.mubr.msk.f32.mxu0 %vm2570_vm3, %v2569_v28  ;;  %2393 = vmatprep.subr.mxu0 %v2569_v28  ;;  %v810_v7 = vsub.f32 %v808_v4, %v809_v5  ;;  %v1734_v18 = vsub.f32 %v1664_v15, %v1733_v17 }
 0x1a6   : > { %2417 = vmatpush3.msra.mxu1 %v2659_v45  ;;  %2418 = vmatprep.mubr.msk.f32.mxu1 %vm2570_vm3, %v2569_v28 }
 0x1a7   : > { %2384 = vmatmul.mubr.f32.vlgmr.msra.gmra.mxu0 %v344_v61  ;;  %2419 = vmatmul.mubr.f32.vlgmr.msra.gmra.mxu1 %v2695_v3  ;;  %v811_v9 = vand.u32 4294901760, %v810_v7  ;;  %v1735_v19 = vand.u32 4294901760, %v1734_v18 }
 0x1a8   : > { %2394 = vmatpush3.msra.mxu0 %v2645_v39  ;;  %2428 = vmatprep.subr.mxu1 %v2569_v28 }
 0x1a9   : > { %2395 = vmatprep.subr.mxu0 %v2569_v28  ;;  %2429 = vmatpush3.msk.msra.mxu1 %vm272_vm1, %v2628_v34  ;;  %v1736_v20 = vsub.f32 %v1734_v18, %v1735_v19 }
 0x1aa   : > { %2396 = vmatpush3.msra.mxu0 %v2652_v42  ;;  %2430 = vmatprep.subr.mxu1 %v2569_v28 }
 0x1ab   : > { %2397 = vmatprep.mubr.msk.f32.mxu0 %vm2570_vm3, %v2569_v28  ;;  %2407 = vmatprep.subr.mxu0 %v2569_v28  ;;  %v1737_v21 = vand.u32 4294901760, %v1736_v20 }
 0x1ac   : > { %2431 = vmatpush3.msk.msra.mxu1 %vm2636_vm2, %v2571_v46  ;;  %2432 = vmatprep.mubr.msk.f32.mxu1 %vm2570_vm3, %v2569_v28 }
 0x1ad   : > { %2398 = vmatmul.mubr.f32.vlgmr.msra.gmra.mxu0 %v343_v60  ;;  %2433 = vmatmul.mubr.f32.vlgmr.msra.gmra.mxu1 %v809_v5 }
 0x1ae   : > { %2408 = vmatpush3.msk.msra.mxu0 %vm272_vm1, %v2628_v34  ;;  %2442 = vmatprep.subr.mxu1 %v2569_v28 }
 0x1af   : > { %2409 = vmatprep.subr.mxu0 %v2569_v28  ;;  %2443 = vmatpush3.msk.msra.mxu1 %vm272_vm1, %v2628_v34 }
 0x1b0   : > { %2410 = vmatpush3.msk.msra.mxu0 %vm2636_vm2, %v2571_v46  ;;  %2444 = vmatprep.subr.mxu1 %v2569_v28 }
 0x1b1   : > { %2411 = vmatprep.mubr.msk.f32.mxu0 %vm2570_vm3, %v2569_v28  ;;  %2421 = vmatprep.subr.mxu0 %v2569_v28 }
 0x1b2   : > { %2445 = vmatpush3.msk.msra.mxu1 %vm2636_vm2, %v2571_v46  ;;  %2446 = vmatprep.mubr.msk.f32.mxu1 %vm2570_vm3, %v2569_v28 }
 0x1b3   : > { %2412 = vmatmul.mubr.f32.vlgmr.msra.gmra.mxu0 %v811_v9  ;;  %2447 = vmatmul.mubr.f32.vlgmr.msra.gmra.mxu1 %v2695_v3 }
 0x1b4   : > { %2422 = vmatpush3.msra.mxu0 %v2634_v36  ;;  %2456 = vmatprep.subr.mxu1 %v2569_v28 }
 0x1b5   : > { %2423 = vmatprep.subr.mxu0 %v2569_v28  ;;  %2457 = vmatpush3.msra.mxu1 %v2654_v43 }
 0x1b6   : > { %2424 = vmatpush3.msra.mxu0 %v2647_v40  ;;  %2458 = vmatprep.subr.mxu1 %v2569_v28 }
 0x1b7   : > { %2425 = vmatprep.mubr.msk.f32.mxu0 %vm2570_vm3, %v2569_v28  ;;  %2435 = vmatprep.subr.mxu0 %v2569_v28 }
 0x1b8   : > { %2459 = vmatpush3.msra.mxu1 %v2659_v45  ;;  %2460 = vmatprep.mubr.msk.f32.mxu1 %vm2570_vm3, %v2569_v28 }
 0x1b9   : > { %2426 = vmatmul.mubr.f32.vlgmr.msra.gmra.mxu0 %v808_v4  ;;  %2461 = vmatmul.mubr.f32.vlgmr.msra.gmra.mxu1 %v2745_v10 }
 0x1ba   : > { %2436 = vmatpush3.msra.mxu0 %v2645_v39  ;;  %2470 = vmatprep.subr.mxu1 %v2569_v28 }
 0x1bb   : > { %2437 = vmatprep.subr.mxu0 %v2569_v28  ;;  %2471 = vmatpush3.msk.msra.mxu1 %vm272_vm1, %v2628_v34 }
 0x1bc   : > { %2438 = vmatpush3.msra.mxu0 %v2652_v42  ;;  %2472 = vmatprep.subr.mxu1 %v2569_v28 }
 0x1bd   : > { %2439 = vmatprep.mubr.msk.f32.mxu0 %vm2570_vm3, %v2569_v28  ;;  %2449 = vmatprep.subr.mxu0 %v2569_v28 }
 0x1be   : > { %2473 = vmatpush3.msk.msra.mxu1 %vm2636_vm2, %v2571_v46  ;;  %2474 = vmatprep.mubr.msk.f32.mxu1 %vm2570_vm3, %v2569_v28 }
 0x1bf   : > { %2440 = vmatmul.mubr.f32.vlgmr.msra.gmra.mxu0 %v2695_v3  ;;  %2475 = vmatmul.mubr.f32.vlgmr.msra.gmra.mxu1 %v1272_v12 }
 0x1c0   : > { %2450 = vmatpush3.msk.msra.mxu0 %vm272_vm1, %v2628_v34  ;;  %2484 = vmatprep.subr.mxu1 %v2569_v28 }
 0x1c1   : > { %2451 = vmatprep.subr.mxu0 %v2569_v28  ;;  %2485 = vmatpush3.msk.msra.mxu1 %vm272_vm1, %v2628_v34 }
 0x1c2   : > { %2452 = vmatpush3.msk.msra.mxu0 %vm2636_vm2, %v2571_v46  ;;  %2486 = vmatprep.subr.mxu1 %v2569_v28 }
 0x1c3   : > { %2453 = vmatprep.mubr.msk.f32.mxu0 %vm2570_vm3, %v2569_v28  ;;  %2463 = vmatprep.subr.mxu0 %v2569_v28 }
 0x1c4   : > { %2487 = vmatpush3.msk.msra.mxu1 %vm2636_vm2, %v2571_v46  ;;  %2488 = vmatprep.mubr.msk.f32.mxu1 %vm2570_vm3, %v2569_v28 }
 0x1c5   : > { %2454 = vmatmul.mubr.f32.vlgmr.msra.gmra.mxu0 %v1274_v16  ;;  %2489 = vmatmul.mubr.f32.vlgmr.msra.gmra.mxu1 %v2745_v10 }
 0x1c6   : > { %2464 = vmatpush3.msra.mxu0 %v2634_v36  ;;  %2498 = vmatprep.subr.mxu1 %v2569_v28 }
 0x1c7   : > { %2465 = vmatprep.subr.mxu0 %v2569_v28  ;;  %2499 = vmatpush3.msra.mxu1 %v2654_v43 }
 0x1c8   : > { %2466 = vmatpush3.msra.mxu0 %v2647_v40  ;;  %2500 = vmatprep.subr.mxu1 %v2569_v28 }
 0x1c9   : > { %2467 = vmatprep.mubr.msk.f32.mxu0 %vm2570_vm3, %v2569_v28  ;;  %2477 = vmatprep.subr.mxu0 %v2569_v28 }
 0x1ca   : > { %2501 = vmatpush3.msra.mxu1 %v2659_v45  ;;  %2502 = vmatprep.mubr.msk.f32.mxu1 %vm2570_vm3, %v2569_v28 }
 0x1cb   : > { %2468 = vmatmul.mubr.f32.vlgmr.msra.gmra.mxu0 %v1271_v11  ;;  %2503 = vmatmul.mubr.f32.vlgmr.msra.gmra.mxu1 %v1733_v17 }
 0x1cc   : > { %2478 = vmatpush3.msra.mxu0 %v2645_v39  ;;  %2512 = vmatprep.subr.mxu1 %v2569_v28 }
 0x1cd   : > { %2479 = vmatprep.subr.mxu0 %v2569_v28  ;;  %2513 = vmatpush3.msk.msra.mxu1 %vm272_vm1, %v2628_v34 }
 0x1ce   : > { %2480 = vmatpush3.msra.mxu0 %v2652_v42  ;;  %2514 = vmatprep.subr.mxu1 %v2569_v28 }
 0x1cf   : > { %2481 = vmatprep.mubr.msk.f32.mxu0 %vm2570_vm3, %v2569_v28  ;;  %2491 = vmatprep.subr.mxu0 %v2569_v28 }
 0x1d0   : > { %2515 = vmatpush3.msk.msra.mxu1 %vm2636_vm2, %v2571_v46  ;;  %2516 = vmatprep.mubr.msk.f32.mxu1 %vm2570_vm3, %v2569_v28 }
 0x1d1   : > { %2482 = vmatmul.mubr.f32.vlgmr.msra.gmra.mxu0 %v2745_v10  ;;  %2517 = vmatmul.mubr.f32.vlgmr.msra.gmra.mxu1 %v1735_v19 }
 0x1d2   : > { %2492 = vmatpush3.msk.msra.mxu0 %vm272_vm1, %v2628_v34  ;;  %2526 = vmatprep.subr.mxu1 %v2569_v28 }
 0x1d3   : > { %2493 = vmatprep.subr.mxu0 %v2569_v28  ;;  %2527 = vmatpush3.msk.msra.mxu1 %vm272_vm1, %v2628_v34 }
 0x1d4   : > { %2494 = vmatpush3.msk.msra.mxu0 %vm2636_vm2, %v2571_v46  ;;  %2528 = vmatprep.subr.mxu1 %v2569_v28 }
 0x1d5   : > { %2495 = vmatprep.mubr.msk.f32.mxu0 %vm2570_vm3, %v2569_v28  ;;  %2505 = vmatprep.subr.mxu0 %v2569_v28 }
 0x1d6   : > { %2529 = vmatpush3.msk.msra.mxu1 %vm2636_vm2, %v2571_v46  ;;  %2530 = vmatprep.mubr.msk.f32.mxu1 %vm2570_vm3, %v2569_v28 }
 0x1d7   : > { %2496 = vmatmul.mubr.f32.vlgmr.msra.gmra.mxu0 %v1737_v21  ;;  %2531 = vmatmul.mubr.f32.vlgmr.msra.gmra.mxu1 %v1733_v17 }
 0x1d8   : > { %2506 = vmatpush3.msra.mxu0 %v2634_v36  ;;  %2509 = vmatprep.mubr.msk.f32.mxu0 %vm2570_vm3, %v2569_v28 }
 0x1d9   : > { %2507 = vmatprep.subr.mxu0 %v2569_v28 }
 0x1da   : > { %2508 = vmatpush3.msra.mxu0 %v2647_v40 }
 0x1db   : > { %2519 = vmatprep.subr.mxu0 %v2569_v28  ;;  %2510 = vmatmul.mubr.f32.vlgmr.msra.gmra.mxu0 %v1734_v18 }
 0x1dc   : > { %2520 = vmatpush3.msra.mxu0 %v2645_v39  ;;  %2523 = vmatprep.mubr.msk.f32.mxu0 %vm2570_vm3, %v2569_v28 }
 0x1dd   : > { %2521 = vmatprep.subr.mxu0 %v2569_v28 }
 0x1de   : > { %2522 = vmatpush3.msra.mxu0 %v2652_v42 }
 0x1df   : > { %2524 = vmatmul.mubr.f32.vlgmr.msra.gmra.mxu0 %v1733_v17 }
 0x259   : > { %v430_v22 = vpop.f32.mrf.mxu1 }
 0x25b   : > { %v2378_v23 = vpop.f32.mrf.mxu1 }
 0x25d   : > { %v581_v24 = vpop.f32.mrf.mxu1 }
 0x25f   : > { %v2392_v25 = vpop.f32.mrf.mxu1 }
 0x261   : > { %v349_v26 = vpop.f32.mrf.mxu0  ;;  %v731_v27 = vpop.f32.mrf.mxu1 }
 0x262   : > { %v431_v29 = vadd.f32 %v430_v22, %v349_v26 }
 0x263   : > { %v2371_v30 = vpop.f32.mrf.mxu0  ;;  %v2406_v31 = vpop.f32.mrf.mxu1 }
 0x267   : > { %v506_v32 = vpop.f32.mrf.mxu0  ;;  %v894_v33 = vpop.f32.mrf.mxu1 }
 0x268   : > { %v507_v34 = vadd.f32 %v506_v32, %v431_v29 }
 0x269   : > { %v2385_v35 = vpop.f32.mrf.mxu0  ;;  %v2420_v36 = vpop.f32.mrf.mxu1 }
 0x26a   : > { %v582_v37 = vadd.f32 %v581_v24, %v507_v34 }
 0x26d   : > { %v658_v38 = vpop.f32.mrf.mxu0  ;;  %v1045_v28 = vpop.f32.mrf.mxu1 }
 0x26e   : > { %v659_v39 = vadd.f32 %v658_v38, %v582_v37 }
 0x26f   : > { %v2399_v40 = vpop.f32.mrf.mxu0  ;;  %v2434_v41 = vpop.f32.mrf.mxu1 }
 0x270   : > { %v2855_v42 = vadd.f32 %v731_v27, %v659_v39 }
 0x272   : > { %v2144_v37 = vmul.f32 %v2855_v42, %v2855_v42 }
 0x273   : > { %v813_v43 = vpop.f32.mrf.mxu0  ;;  %v1195_v44 = vpop.f32.mrf.mxu1 }
 0x274   : > { %v895_v3 = vadd.f32 %v894_v33, %v813_v43 }
 0x275   : > { %v2413_v45 = vpop.f32.mrf.mxu0  ;;  %v2448_v46 = vpop.f32.mrf.mxu1 }
 0x279   : > { %v970_v47 = vpop.f32.mrf.mxu0  ;;  %v1357_v48 = vpop.f32.mrf.mxu1 }
 0x27a   : > { %v971_v4 = vadd.f32 %v970_v47, %v895_v3 }
 0x27b   : > { %v2427_v49 = vpop.f32.mrf.mxu0  ;;  %v2462_v50 = vpop.f32.mrf.mxu1 }
 0x27c   : > { %v1046_v9 = vadd.f32 %v1045_v28, %v971_v4 }
 0x27f   : > { %v1122_v51 = vpop.f32.mrf.mxu0  ;;  %v1508_v52 = vpop.f32.mrf.mxu1 }
 0x280   : > { %v1123_v14 = vadd.f32 %v1122_v51, %v1046_v9 }
 0x281   : > { %v2441_v53 = vpop.f32.mrf.mxu0  ;;  %v2476_v54 = vpop.f32.mrf.mxu1 }
 0x282   : > { %v1196_v19 = vadd.f32 %v1195_v44, %v1123_v14 }
 0x284   : > { %v2145_v39 = vadd.f32 %v2144_v37, %v1196_v19 }
 0x285   : > { %v1276_v55 = vpop.f32.mrf.mxu0  ;;  %v1658_v56 = vpop.f32.mrf.mxu1 }
 0x286   : > { %v1358_v20 = vadd.f32 %v1357_v48, %v1276_v55 }
 0x287   : > { %v2455_v57 = vpop.f32.mrf.mxu0  ;;  %v2490_v58 = vpop.f32.mrf.mxu1 }
 0x28b   : > { %v1433_v59 = vpop.f32.mrf.mxu0  ;;  %v1820_v60 = vpop.f32.mrf.mxu1 }
 0x28c   : > { %v1434_v22 = vadd.f32 %v1433_v59, %v1358_v20 }
 0x28d   : > { %v2469_v61 = vpop.f32.mrf.mxu0  ;;  %v2504_v62 = vpop.f32.mrf.mxu1 }
 0x28e   : > { %v1509_v25 = vadd.f32 %v1508_v52, %v1434_v22 }
 0x291   : > { %v1585_v63 = vpop.f32.mrf.mxu0  ;;  %v1971_v0 = vpop.f32.mrf.mxu1 }
 0x292   : > { %v1586_v26 = vadd.f32 %v1585_v63, %v1509_v25 }
 0x293   : > { %v2483_v1 = vpop.f32.mrf.mxu0  ;;  %v2518_v2 = vpop.f32.mrf.mxu1 }
 0x294   : > { %v1659_v27 = vadd.f32 %v1658_v56, %v1586_v26 }
 0x296   : > { %v2129_v29 = vsub.f32 %v2855_v42, %v1659_v27  ;;  %v2146_v36 = vmul.f32 %v1659_v27, %v1659_v27  ;;  %v2151_v49 = vadd.f32 %v1659_v27, %v2855_v42 }
 0x297   : > { %v1739_v5 = vpop.f32.mrf.mxu0  ;;  %v2121_v6 = vpop.f32.mrf.mxu1 }
 0x298   : > { %v1821_v10 = vadd.f32 %v1820_v60, %v1739_v5 }
 0x299   : > { %v2497_v7 = vpop.f32.mrf.mxu0  ;;  %v2532_v8 = vpop.f32.mrf.mxu1 }
 0x29b   : > { %v1896_v11 = vpop.f32.mrf.mxu0 }
 0x29c   : > { %v1897_v12 = vadd.f32 %v1896_v11, %v1821_v10 }
 0x29d   : > { %v2511_v13 = vpop.f32.mrf.mxu0 }
 0x29e   : > { %v1972_v15 = vadd.f32 %v1971_v0, %v1897_v12 }
 0x29f   : > { %v2048_v16 = vpop.f32.mrf.mxu0 }
 0x2a0   : > { %v2049_v17 = vadd.f32 %v2048_v16, %v1972_v15 }
 0x2a1   : > { %v2525_v18 = vpop.f32.mrf.mxu0 }
 0x2a2   : > { %v2122_v21 = vadd.f32 %v2121_v6, %v2049_v17 }
 0x2a4   : > { %v2125_v23 = vadd.f32 %v2122_v21, %v1196_v19  ;;  %v2147_v38 = vadd.f32 %v2146_v36, %v2122_v21 }
 0x2a6   : > { %v2126_v24 = vmax.f32 %v2125_v23, 1.1754944e-38  ;;  %v2148_v43 = vsub.f32 %v2145_v39, %v2147_v38 }
 0x2a8   : > { %2553 = vrsqrt.f32 %v2126_v24 }
 0x2b5   : > { %v2554_v30 = vpop.eup %2553 }
 0x2b6   : > { %v2130_v31 = vmul.f32 %v2554_v30, %v2129_v29  ;;  %v2128_v45 = vmul.f32 %v2554_v30, %v2126_v24 }
 0x2b8   : > { %v2131_v32 = vmul.f32 0.70710677, %v2130_v31  ;;  %v2135_v33 = vmul.f32 -0.5, %v2130_v31 }
 0x2ba   : > { %2555 = verf.f32 %v2131_v32  ;;  %v2136_v34 = vmul.f32 %v2135_v33, %v2130_v31 }
 0x2bc   : > { %v2137_v35 = vmul.f32 1.442695, %v2136_v34 }
 0x2be   : > { %2557 = vpow2.f32 %v2137_v35 }
 0x2c7   : > { %v2556_v28 = vpop.eup %2555 }
 0x2c8   : > { %v2133_v40 = vadd.f32 1.0, %v2556_v28 }
 0x2ca   : > { %v2134_v41 = vmul.f32 0.5, %v2133_v40 }
 0x2cb   : > { %v2558_v44 = vpop.eup %2557 }
 0x2cc   : > { %v2139_v46 = vmul.f32 0.3989423, %v2558_v44  ;;  %v2141_v47 = vmul.f32 %v2134_v41, %v2129_v29  ;;  %v2149_v48 = vmul.f32 %v2148_v43, %v2134_v41 }
 0x2ce   : > { %v2140_v50 = vmul.f32 %v2139_v46, %v2128_v45  ;;  %v2142_v51 = vadd.f32 %v2141_v47, %v1659_v27  ;;  %v2150_v53 = vadd.f32 %v2149_v48, %v2147_v38 }
 0x2d0   : > { %v2143_v52 = vadd.f32 %v2142_v51, %v2140_v50  ;;  %v2152_v54 = vmul.f32 %v2151_v49, %v2140_v50 }
 0x2d2   : > { %v2153_v55 = vadd.f32 %v2152_v54, %v2150_v53  ;;  %v2154_v56 = vmul.f32 %v2143_v52, %v2143_v52  ;;  %2158 = vst.msk [vmem:[%s189_s26] sm:$0xff] %vm2157_vm5, %v2143_v52 }
 0x2d4   : > { %v2155_v57 = vsub.f32 %v2153_v55, %v2154_v56 }
 0x2d6   : > { %v2156_v58 = vmax.f32 %v2155_v57, 0.0 }
 0x2d8   : > { %2159 = vst.msk [vmem:[%s193_s29] sm:$0xff] %vm2157_vm5, %v2156_v58 }
 0x2d9 PF: > { %s14_s12 = sadd.s32 1, %s2565_s12  }
 0x2da   : > { %p11_p4 = scmp.ge.s32.totalorder %s14_s12, 10  }
 0x2dc   :  { %13 = sbr.rel (!%p11_p4) target bundleno = 1 (0x1), region = 73 }

</bundles_post_ra>
